<compile_context>
chip_gen: v7x
topology: tpu7x:2x2x1
jax: 0.10.0
libtpu: 0.0.40
codegen_flags: <defaults>
</compile_context>

<pallas_src>
import functools
import math

import jax
import jax.numpy as jnp
from jax.experimental import pallas as pl
from jax.experimental.pallas import tpu as pltpu

# ----------------------- model dimensions (small, synthetic) -----------------
E = 64       # encoded_dim
D = 32       # input_dim_attention (compressed dim)
P = 16       # projection_dim_attention
C = 2        # n_classes
N = 64       # number of instances (tiles) in the bag
N_INST = 8   # n_inst for instance-level clustering
SUBTYPING = False     # TODO(synk): subtyping (out-of-class) branch not implemented
MULTI_BRANCH = True   # TODO(synk): single-branch CLAM variant not implemented


def _vmem():
    # whole-array VMEM spec (no grid, no index_map)
    return pl.BlockSpec(memory_space=pltpu.MemorySpace.VMEM)


# ------------- fused kernel: backbone + softmax + bag + bag-classifier -------
def fused_clam_kernel(x_ref, wfc_ref, bfc_ref, wab_ref, bab_ref, wc_ref, bc_ref,
                      wbag_ref, bbag_ref,
                      h_ref, att_ref, logits_ref):
    x = x_ref[...]                                                       # (N, E)
    # h = relu(x @ Wfc + b)
    h = jnp.maximum(
        jnp.dot(x, wfc_ref[...], preferred_element_type=jnp.float32) + bfc_ref[...],
        0.0)                                                             # (N, D)
    h_ref[...] = h

    # packed attention projections: one matmul, then slice tanh / sigmoid halves
    ag = jnp.dot(h, wab_ref[...], preferred_element_type=jnp.float32) + bab_ref[...]
    a = jnp.tanh(ag[:, :P])
    g = jax.nn.sigmoid(ag[:, P:])
    prod = a * g                                                         # (N, P)

    # attention computed directly in transposed (C, N) layout:
    # w_c stored (C, P); contract both last dims (q @ k^T pattern on the MXU).
    att_t = jax.lax.dot_general(
        wc_ref[...], prod, (((1,), (1,)), ((), ())),
        preferred_element_type=jnp.float32) + bc_ref[...]                # (C, N)
    att_ref[...] = att_t

    # softmax over instances (lane axis), EUP reciprocal for the denominator
    m = jnp.max(att_t, axis=-1, keepdims=True)
    e = jnp.exp(att_t - m)
    denom = jnp.sum(e, axis=-1, keepdims=True)
    sm = e * pl.reciprocal(denom, approx=True)                           # (C, N)

    # bag representations + per-class bag-classifier logits (VMEM-resident only)
    bag = jnp.dot(sm, h, preferred_element_type=jnp.float32)             # (C, D)
    scores = jnp.dot(bag, wbag_ref[...],
                     preferred_element_type=jnp.float32)                 # (C, C)
    rows = jax.lax.broadcasted_iota(jnp.int32, (C, C), 0)
    cols = jax.lax.broadcasted_iota(jnp.int32, (C, C), 1)
    eye = (rows == cols).astype(jnp.float32)
    # diag(bag @ Wbag) laid out lane-dense as a (1, C) row + bias
    logits_ref[...] = jnp.sum(scores * eye, axis=0, keepdims=True) + bbag_ref[...]


def fused_backbone_bag(x, params):
    n = x.shape[0]
    args = (x, params["w_fc"], params["b_fc"], params["w_ab"], params["b_ab"],
            params["w_c"], params["b_c"], params["w_bag"], params["b_bag"])
    return pl.pallas_call(
        fused_clam_kernel,
        in_specs=[_vmem() for _ in args],
        out_specs=[_vmem(), _vmem(), _vmem()],
        out_shape=[jax.ShapeDtypeStruct((n, D), jnp.float32),   # h
                   jax.ShapeDtypeStruct((C, n), jnp.float32),   # raw attention^T
                   jax.ShapeDtypeStruct((1, C), jnp.float32)],  # bag logits
    )(*args)


# --------------- instance-level classifier: one-hot gather + linear ----------
def instance_classifier_kernel(idx_ref, h_ref, w_ref, b_ref, o_ref):
    m = idx_ref.shape[0]
    n = h_ref.shape[0]
    cols = jax.lax.broadcasted_iota(jnp.int32, (m, n), 1)
    onehot = (cols == idx_ref[...]).astype(jnp.float32)                  # (m, N)
    gathered = jnp.dot(onehot, h_ref[...],
                       preferred_element_type=jnp.float32)               # (m, D)
    o_ref[...] = jnp.dot(gathered, w_ref[...],
                         preferred_element_type=jnp.float32) + b_ref[...]


def instance_classifier(idx_col, h, w, b):
    m = idx_col.shape[0]
    o = w.shape[1]
    return pl.pallas_call(
        instance_classifier_kernel,
        in_specs=[_vmem()] * 4,
        out_specs=_vmem(),
        out_shape=jax.ShapeDtypeStruct((m, o), jnp.float32),
    )(idx_col, h, w, b)


# ------------------------------- parameter init -------------------------------
def _xavier(key, shape, fan_in, fan_out):
    std = math.sqrt(2.0 / (fan_in + fan_out))
    return std * jax.random.normal(key, shape, dtype=jnp.float32)


def init_params(key):
    k = jax.random.split(key, 6)
    ka, kb = jax.random.split(k[1])
    w_a = _xavier(ka, (D, P), D, P)
    w_b = _xavier(kb, (D, P), D, P)
    kbag = jax.random.split(k[3], C)
    kinst = jax.random.split(k[4], C)
    return {
        "w_fc": _xavier(k[0], (E, D), E, D),
        "b_fc": jnp.zeros((1, D), jnp.float32),
        # tanh | sigmoid branches packed into one (D, 2P) weight
        "w_ab": jnp.concatenate([w_a, w_b], axis=1),
        "b_ab": jnp.zeros((1, 2 * P), jnp.float32),
        # attention head stored (out, in) = (C, P) so att^T is computed natively
        "w_c": _xavier(k[2], (C, P), P, C),
        "b_c": jnp.zeros((C, 1), jnp.float32),
        # bag classifiers: C independent Linear(D, 1) stacked as columns (D, C)
        "w_bag": jnp.concatenate([_xavier(kk, (D, 1), D, 1) for kk in kbag], axis=1),
        "b_bag": jnp.zeros((1, C), jnp.float32),
        # instance classifiers: C independent Linear(D, 2), stacked (C, D, 2)
        "w_inst": jnp.stack([_xavier(kk, (D, 2), D, 2) for kk in kinst], axis=0),
        "b_inst": jnp.zeros((C, 1, 2), jnp.float32),
    }


# ------------------------------ instance evaluation ---------------------------
def eval_instances(raw_att, h, label, params):
    # softmax is monotonic per row -> top-k / bottom-k indices of the softmaxed
    # attention equal those of the raw attention row (no host branch, no sync).
    a_row = jnp.take(raw_att, label, axis=0)                       # (N,)
    top_p_ids = jax.lax.top_k(a_row, N_INST)[1]
    top_n_ids = jax.lax.top_k(-a_row, N_INST)[1]
    idx = jnp.concatenate([top_p_ids, top_n_ids]).astype(jnp.int32)[:, None]
    w = jnp.take(params["w_inst"], label, axis=0)                  # (D, 2)
    b = jnp.take(params["b_inst"], label, axis=0)                  # (1, 2)
    logits = instance_classifier(idx, h, w, b)                     # (2K, 2)
    preds = jnp.argmax(logits, axis=1)
    targets = jnp.concatenate([jnp.ones((N_INST,), jnp.int32),
                               jnp.zeros((N_INST,), jnp.int32)])
    # TODO(synk): SmoothTop1SVM instance loss comes from the external `topk.svm`
    # package; not reimplemented (loss left at 0.0).
    return {"instance_loss": jnp.float32(0.0),
            "inst_labels": targets,
            "inst_predictions": preds}


# ----------------------------------- forward ----------------------------------
@functools.partial(jax.jit, static_argnames=("instance_eval", "attention_only"))
def clam_forward(x, label, params, instance_eval=True, attention_only=False):
    h, raw_att, logits = fused_backbone_bag(x, params)            # (N,D),(C,N),(1,C)
    if attention_only:
        return raw_att
    results = {}
    if instance_eval:
        results = eval_instances(raw_att, h, label, params)
    y_class = jnp.argmax(logits, axis=1)[:, None]                 # torch.topk(...,1)[1]
    y_proba = jax.nn.softmax(logits, axis=1)
    results.update({"logits": logits, "y_class": y_class,
                    "y_proba": y_proba, "raw_attention": raw_att})
    return results


# ------------------------------------ main -------------------------------------
if __name__ == "__main__":
    key = jax.random.PRNGKey(0)
    pkey, xkey = jax.random.split(key)
    params = init_params(pkey)
    x = jax.random.normal(xkey, (N, E), dtype=jnp.float32)   # bag of N tiles
    label = jnp.array(1, dtype=jnp.int32)                    # bag label (device scalar)

    out = clam_forward(x, label, params)
    out = jax.block_until_ready(out)

    assert out["logits"].shape == (1, C)
    assert out["y_proba"].shape == (1, C)
    assert out["y_class"].shape == (1, 1)
    assert out["raw_attention"].shape == (C, N)
    assert out["inst_predictions"].shape == (2 * N_INST,)
    assert out["inst_labels"].shape == (2 * N_INST,)
    print("KERNEL_OK")
</pallas_src>

<mosaic_0001>
module attributes {stable_mosaic.version = 11 : i64} {
  func.func @fused_clam_kernel(%arg0: memref<64x64xf32, #tpu.memory_space<vmem>>, %arg1: memref<64x32xf32, #tpu.memory_space<vmem>>, %arg2: memref<1x32xf32, #tpu.memory_space<vmem>>, %arg3: memref<32x32xf32, #tpu.memory_space<vmem>>, %arg4: memref<1x32xf32, #tpu.memory_space<vmem>>, %arg5: memref<2x16xf32, #tpu.memory_space<vmem>>, %arg6: memref<2x1xf32, #tpu.memory_space<vmem>>, %arg7: memref<32x2xf32, #tpu.memory_space<vmem>>, %arg8: memref<1x2xf32, #tpu.memory_space<vmem>>, %arg9: memref<64x32xf32, #tpu.memory_space<vmem>>, %arg10: memref<2x64xf32, #tpu.memory_space<vmem>>, %arg11: memref<1x2xf32, #tpu.memory_space<vmem>>) attributes {dimension_semantics = [], scalar_prefetch = 0 : i64, scratch_operands = 0 : i64, tpu.core_type = #tpu.core_type<tc>} {
    %c0 = arith.constant 0 : index
    %c0_0 = arith.constant 0 : index
    %0 = vector.load %arg0[%c0, %c0_0] : memref<64x64xf32, #tpu.memory_space<vmem>>, vector<64x64xf32>
    %c0_1 = arith.constant 0 : index
    %c0_2 = arith.constant 0 : index
    %1 = vector.load %arg1[%c0_1, %c0_2] : memref<64x32xf32, #tpu.memory_space<vmem>>, vector<64x32xf32>
    %cst = arith.constant dense<0.000000e+00> : vector<64x32xf32>
    %2 = tpu.matmul %0, %1, %cst {dimension_numbers = #tpu.dot_dimension_numbers<[1], [0], [0], [1], [0, 0, 1, 1], [], []>} : vector<64x64xf32>, vector<64x32xf32>, vector<64x32xf32> -> vector<64x32xf32>
    %c0_3 = arith.constant 0 : index
    %c0_4 = arith.constant 0 : index
    %3 = vector.load %arg2[%c0_3, %c0_4] : memref<1x32xf32, #tpu.memory_space<vmem>>, vector<1x32xf32>
    %4 = vector.broadcast %3 : vector<1x32xf32> to vector<64x32xf32>
    %5 = arith.addf %2, %4 : vector<64x32xf32>
    %cst_5 = arith.constant 0.000000e+00 : f32
    %6 = vector.broadcast %cst_5 : f32 to vector<64x32xf32>
    %7 = arith.maximumf %5, %6 : vector<64x32xf32>
    %c0_6 = arith.constant 0 : index
    %c0_7 = arith.constant 0 : index
    %8 = vector.load %arg9[%c0_6, %c0_7] : memref<64x32xf32, #tpu.memory_space<vmem>>, vector<64x32xf32>
    tpu.vector_store %arg9[%c0_6, %c0_7], %7 {strides = array<i32>} : memref<64x32xf32, #tpu.memory_space<vmem>>, vector<64x32xf32>,
    %c0_8 = arith.constant 0 : index
    %c0_9 = arith.constant 0 : index
    %9 = vector.load %arg3[%c0_8, %c0_9] : memref<32x32xf32, #tpu.memory_space<vmem>>, vector<32x32xf32>
    %cst_10 = arith.constant dense<0.000000e+00> : vector<64x32xf32>
    %10 = tpu.matmul %7, %9, %cst_10 {dimension_numbers = #tpu.dot_dimension_numbers<[1], [0], [0], [1], [0, 0, 1, 1], [], []>} : vector<64x32xf32>, vector<32x32xf32>, vector<64x32xf32> -> vector<64x32xf32>
    %c0_11 = arith.constant 0 : index
    %c0_12 = arith.constant 0 : index
    %11 = vector.load %arg4[%c0_11, %c0_12] : memref<1x32xf32, #tpu.memory_space<vmem>>, vector<1x32xf32>
    %12 = vector.broadcast %11 : vector<1x32xf32> to vector<64x32xf32>
    %13 = arith.addf %10, %12 : vector<64x32xf32>
    %14 = vector.extract_strided_slice %13 {offsets = [0, 0], sizes = [64, 16], strides = [1, 1]} : vector<64x32xf32> to vector<64x16xf32>
    %15 = math.tanh %14 : vector<64x16xf32>
    %16 = vector.extract_strided_slice %13 {offsets = [0, 16], sizes = [64, 16], strides = [1, 1]} : vector<64x32xf32> to vector<64x16xf32>
    %17 = arith.negf %16 : vector<64x16xf32>
    %18 = math.exp %17 : vector<64x16xf32>
    %cst_13 = arith.constant 1.000000e+00 : f32
    %19 = vector.broadcast %cst_13 : f32 to vector<64x16xf32>
    %20 = arith.addf %19, %18 : vector<64x16xf32>
    %21 = arith.divf %19, %20 : vector<64x16xf32>
    %22 = arith.mulf %15, %21 : vector<64x16xf32>
    %c0_14 = arith.constant 0 : index
    %c0_15 = arith.constant 0 : index
    %23 = vector.load %arg5[%c0_14, %c0_15] : memref<2x16xf32, #tpu.memory_space<vmem>>, vector<2x16xf32>
    %cst_16 = arith.constant dense<0.000000e+00> : vector<2x64xf32>
    %24 = tpu.matmul %23, %22, %cst_16 {dimension_numbers = #tpu.dot_dimension_numbers<[1], [1], [0], [0], [0, 0, 1, 0], [], []>} : vector<2x16xf32>, vector<64x16xf32>, vector<2x64xf32> -> vector<2x64xf32>
    %c0_17 = arith.constant 0 : index
    %c0_18 = arith.constant 0 : index
    %25 = vector.load %arg6[%c0_17, %c0_18] : memref<2x1xf32, #tpu.memory_space<vmem>>, vector<2x1xf32>
    %26 = vector.broadcast %25 : vector<2x1xf32> to vector<2x64xf32>
    %27 = arith.addf %24, %26 : vector<2x64xf32>
    %c0_19 = arith.constant 0 : index
    %c0_20 = arith.constant 0 : index
    %28 = vector.load %arg10[%c0_19, %c0_20] : memref<2x64xf32, #tpu.memory_space<vmem>>, vector<2x64xf32>
    tpu.vector_store %arg10[%c0_19, %c0_20], %27 {strides = array<i32>} : memref<2x64xf32, #tpu.memory_space<vmem>>, vector<2x64xf32>,
    %cst_21 = arith.constant dense<0xFF800000> : vector<2xf32>
    %29 = vector.multi_reduction <maximumf>, %27, %cst_21 [1] : vector<2x64xf32> to vector<2xf32>
    %30 = vector.shape_cast %29 : vector<2xf32> to vector<2x1xf32>
    %31 = vector.broadcast %30 : vector<2x1xf32> to vector<2x64xf32>
    %32 = arith.subf %27, %31 : vector<2x64xf32>
    %33 = math.exp %32 : vector<2x64xf32>
    %cst_22 = arith.constant dense<0.000000e+00> : vector<2xf32>
    %34 = vector.multi_reduction <add>, %33, %cst_22 [1] : vector<2x64xf32> to vector<2xf32>
    %35 = vector.shape_cast %34 : vector<2xf32> to vector<2x1xf32>
    %36 = tpu.reciprocal %35 {approx = true} : vector<2x1xf32> -> vector<2x1xf32>
    %37 = vector.broadcast %36 : vector<2x1xf32> to vector<2x64xf32>
    %38 = arith.mulf %33, %37 : vector<2x64xf32>
    %cst_23 = arith.constant dense<0.000000e+00> : vector<2x32xf32>
    %39 = tpu.matmul %38, %7, %cst_23 {dimension_numbers = #tpu.dot_dimension_numbers<[1], [0], [0], [1], [0, 0, 1, 1], [], []>} : vector<2x64xf32>, vector<64x32xf32>, vector<2x32xf32> -> vector<2x32xf32>
    %c0_24 = arith.constant 0 : index
    %c0_25 = arith.constant 0 : index
    %40 = vector.load %arg7[%c0_24, %c0_25] : memref<32x2xf32, #tpu.memory_space<vmem>>, vector<32x2xf32>
    %cst_26 = arith.constant dense<0.000000e+00> : vector<2x2xf32>
    %41 = tpu.matmul %39, %40, %cst_26 {dimension_numbers = #tpu.dot_dimension_numbers<[1], [0], [0], [1], [0, 0, 1, 1], [], []>} : vector<2x32xf32>, vector<32x2xf32>, vector<2x2xf32> -> vector<2x2xf32>
    %42 = tpu.iota {dimensions = array<i32: 0>} : vector<2x2xi32>
    %43 = tpu.iota {dimensions = array<i32: 1>} : vector<2x2xi32>
    %44 = arith.cmpi eq, %42, %43 : vector<2x2xi32>
    %45 = arith.extui %44 : vector<2x2xi1> to vector<2x2xi32>
    %46 = arith.sitofp %45 : vector<2x2xi32> to vector<2x2xf32>
    %47 = arith.mulf %41, %46 : vector<2x2xf32>
    %cst_27 = arith.constant dense<0.000000e+00> : vector<2xf32>
    %48 = vector.multi_reduction <add>, %47, %cst_27 [0] : vector<2x2xf32> to vector<2xf32>
    %49 = vector.shape_cast %48 : vector<2xf32> to vector<1x2xf32>
    %c0_28 = arith.constant 0 : index
    %c0_29 = arith.constant 0 : index
    %50 = vector.load %arg8[%c0_28, %c0_29] : memref<1x2xf32, #tpu.memory_space<vmem>>, vector<1x2xf32>
    %51 = arith.addf %49, %50 : vector<1x2xf32>
    %c0_30 = arith.constant 0 : index
    %c0_31 = arith.constant 0 : index
    %52 = vector.load %arg11[%c0_30, %c0_31] : memref<1x2xf32, #tpu.memory_space<vmem>>, vector<1x2xf32>
    tpu.vector_store %arg11[%c0_30, %c0_31], %51 {strides = array<i32>} : memref<1x2xf32, #tpu.memory_space<vmem>>, vector<1x2xf32>,
    return
  }
}

module attributes {stable_mosaic.version = 11 : i64} {
  func.func @instance_classifier_kernel(%arg0: memref<16x1xi32, #tpu.memory_space<vmem>>, %arg1: memref<64x32xf32, #tpu.memory_space<vmem>>, %arg2: memref<32x2xf32, #tpu.memory_space<vmem>>, %arg3: memref<1x2xf32, #tpu.memory_space<vmem>>, %arg4: memref<16x2xf32, #tpu.memory_space<vmem>>) attributes {dimension_semantics = [], scalar_prefetch = 0 : i64, scratch_operands = 0 : i64, tpu.core_type = #tpu.core_type<tc>} {
    %0 = tpu.iota {dimensions = array<i32: 1>} : vector<16x64xi32>
    %c0 = arith.constant 0 : index
    %c0_0 = arith.constant 0 : index
    %1 = vector.load %arg0[%c0, %c0_0] : memref<16x1xi32, #tpu.memory_space<vmem>>, vector<16x1xi32>
    %2 = vector.broadcast %1 : vector<16x1xi32> to vector<16x64xi32>
    %3 = arith.cmpi eq, %0, %2 : vector<16x64xi32>
    %4 = arith.extui %3 : vector<16x64xi1> to vector<16x64xi32>
    %5 = arith.sitofp %4 : vector<16x64xi32> to vector<16x64xf32>
    %c0_1 = arith.constant 0 : index
    %c0_2 = arith.constant 0 : index
    %6 = vector.load %arg1[%c0_1, %c0_2] : memref<64x32xf32, #tpu.memory_space<vmem>>, vector<64x32xf32>
    %cst = arith.constant dense<0.000000e+00> : vector<16x32xf32>
    %7 = tpu.matmul %5, %6, %cst {dimension_numbers = #tpu.dot_dimension_numbers<[1], [0], [0], [1], [0, 0, 1, 1], [], []>} : vector<16x64xf32>, vector<64x32xf32>, vector<16x32xf32> -> vector<16x32xf32>
    %c0_3 = arith.constant 0 : index
    %c0_4 = arith.constant 0 : index
    %8 = vector.load %arg2[%c0_3, %c0_4] : memref<32x2xf32, #tpu.memory_space<vmem>>, vector<32x2xf32>
    %cst_5 = arith.constant dense<0.000000e+00> : vector<16x2xf32>
    %9 = tpu.matmul %7, %8, %cst_5 {dimension_numbers = #tpu.dot_dimension_numbers<[1], [0], [0], [1], [0, 0, 1, 1], [], []>} : vector<16x32xf32>, vector<32x2xf32>, vector<16x2xf32> -> vector<16x2xf32>
    %c0_6 = arith.constant 0 : index
    %c0_7 = arith.constant 0 : index
    %10 = vector.load %arg3[%c0_6, %c0_7] : memref<1x2xf32, #tpu.memory_space<vmem>>, vector<1x2xf32>
    %11 = vector.broadcast %10 : vector<1x2xf32> to vector<16x2xf32>
    %12 = arith.addf %9, %11 : vector<16x2xf32>
    %c0_8 = arith.constant 0 : index
    %c0_9 = arith.constant 0 : index
    %13 = vector.load %arg4[%c0_8, %c0_9] : memref<16x2xf32, #tpu.memory_space<vmem>>, vector<16x2xf32>
    tpu.vector_store %arg4[%c0_8, %c0_9], %12 {strides = array<i32>} : memref<16x2xf32, #tpu.memory_space<vmem>>, vector<16x2xf32>,
    return
  }
}

</mosaic_0001>

<bundles_post_ra>
// kernel: clam_forward.2
= control target key start
LH: loop header
LB: loop body
LE: loop exit
PB: predicated region body
PF: predicated region fallthrough
CT: control target
= control target key end

     0   :  { %vm58_vm0 = vcmask 523264   ;;  %v1043_v26 = vmov 0.0|0.0   ;;  %vm196_vm1 = vcmask 261120   ;;  %vm1045_vm2 = vmmov 0   ;;  %s1315_s1 = inlined_call_operand.vmem [shape: f32[64,32], index: 1, kind: input, shape index: {}]   ;;  %s1316_s0 = inlined_call_operand.vmem [shape: f32[64,64], index: 0, kind: input, shape index: {}]   ;;  %s1317_s3 = inlined_call_operand.vmem [shape: f32[32,32], index: 3, kind: input, shape index: {}]   ;;  %s1318_s2 = inlined_call_operand.vmem [shape: f32[1,32], index: 2, kind: input, shape index: {}]   ;;  %s1319_s9 = inlined_call_operand.vmem [shape: f32[64,32], index: 9, kind: output, shape index: {0}]   ;;  %s1320_s4 = inlined_call_operand.vmem [shape: f32[1,32], index: 4, kind: input, shape index: {}]   ;;  %s1321_s6 = inlined_call_operand.vmem [shape: f32[2,1], index: 6, kind: input, shape index: {}]   ;;  %s1322_s5 = inlined_call_operand.vmem [shape: f32[2,16], index: 5, kind: input, shape index: {}]   ;;  %s1323_s10 = inlined_call_operand.vmem [shape: f32[2,64], index: 10, kind: output, shape index: {1}]   ;;  %s1324_s7 = inlined_call_operand.vmem [shape: f32[32,2], index: 7, kind: input, shape index: {}]   ;;  %s1325_s8 = inlined_call_operand.vmem [shape: f32[1,2], index: 8, kind: input, shape index: {}]   ;;  %s1326_s11 = inlined_call_operand.vmem [shape: f32[1,2], index: 11, kind: output, shape index: {2}]  }
   0x1   :  { %v43_v0 = vld [vmem:[%s1315_s1] sm:$0xff]  ;;  %v44_v1 = vld [vmem:[%s1315_s1 + $0x8] sm:$0xff]  ;;  %v45_v2 = vld [vmem:[%s1315_s1 + $0x10] sm:$0xff]  ;;  %vm448_vm3 = vcmask 130048   ;;  %vm546_vm5 = vcmask 517120   ;;  %vm717_vm7 = vcmask 9216  }
   0x2   :  { %v927_v3 = vpack.c.bf16 %v44_v1, %v43_v0  ;;  %v46_v4 = vld [vmem:[%s1315_s1 + $0x18] sm:$0xff]  ;;  %v47_v6 = vld [vmem:[%s1315_s1 + $0x20] sm:$0xff]  ;;  %v48_v7 = vld [vmem:[%s1315_s1 + $0x28] sm:$0xff]  ;;  %vm727_vm8 = vcmask 8192  }
   0x3   :  { %v931_v5 = vpack.c.bf16 %v46_v4, %v45_v2  ;;  %v35_v8 = vld [vmem:[%s1316_s0] sm:$0xff]  ;;  %v935_v9 = vpack.c.bf16 %v48_v7, %v47_v6  ;;  %v206_v11 = vld [vmem:[%s1317_s3 + $0x8] sm:$0xff]  ;;  %v49_v12 = vld [vmem:[%s1315_s1 + $0x30] sm:$0xff] }
   0x4   :  { %928 = vmatprep.subr.bf16.mxu0 %v927_v3  ;;  %846 = vmatprep.mubr.msk.f32.mxu0 %vm58_vm0, %v35_v8  ;;  %v205_v10 = vld [vmem:[%s1317_s3] sm:$0xff]  ;;  %v50_v13 = vld [vmem:[%s1315_s1 + $0x38] sm:$0xff]  ;;  %v36_v16 = vld [vmem:[%s1316_s0 + $0x8] sm:$0xff] }
   0x5   :  { %930 = vmatpush3.bf16.msra.mxu0 %v927_v3  ;;  %v943_v14 = vpack.c.bf16 %v206_v11, %v205_v10  ;;  %v939_v15 = vpack.c.bf16 %v50_v13, %v49_v12  ;;  %v37_v17 = vld [vmem:[%s1316_s0 + $0x10] sm:$0xff]  ;;  %v38_v18 = vld [vmem:[%s1316_s0 + $0x18] sm:$0xff]  ;;  %v39_v19 = vld [vmem:[%s1316_s0 + $0x20] sm:$0xff] }
   0x6   :  { %932 = vmatprep.subr.bf16.mxu0 %v931_v5  ;;  %v40_v20 = vld [vmem:[%s1316_s0 + $0x28] sm:$0xff]  ;;  %v41_v21 = vld [vmem:[%s1316_s0 + $0x30] sm:$0xff]  ;;  %v42_v22 = vld [vmem:[%s1316_s0 + $0x38] sm:$0xff] }
   0x7   :  { %944 = vmatprep.subr.bf16.mxu1 %v943_v14  ;;  %v207_v23 = vld [vmem:[%s1317_s3 + $0x10] sm:$0xff]  ;;  %v208_v24 = vld [vmem:[%s1317_s3 + $0x18] sm:$0xff]  ;;  %v741_v27 = vld [vmem:[%s1318_s2] ss:$0 sm:$0xff] }
   0x8   :  { %946 = vmatpush3.bf16.msra.mxu1 %v943_v14  ;;  %v947_v25 = vpack.c.bf16 %v208_v24, %v207_v23  ;;  %v750_v56 = vld [vmem:[%s1320_s4] ss:$0 sm:$0xff]  ;;  %s1044_s4 = smov 112   ;;  %vm1269_vm4 = vmpackc.low %vm448_vm3, %vm448_vm3 }
   0x9   :  { %934 = vmatpush3.bf16.msra.mxu0 %v931_v5 }
   0xa   :  { %936 = vmatprep.subr.bf16.mxu0 %v935_v9  ;;  %948 = vmatprep.subr.bf16.mxu1 %v947_v25 }
   0xc   :  { %950 = vmatpush3.bf16.msra.mxu1 %v947_v25 }
   0xd   :  { %938 = vmatpush3.bf16.msra.mxu0 %v935_v9  ;;  %951 = vmatprep.subr.bf16.mxu1 %v1043_v26 }
   0xe   :  { %940 = vmatprep.subr.bf16.mxu0 %v939_v15 }
  0x11   :  { %942 = vmatpush3.bf16.msra.mxu0 %v939_v15 }
  0x12   :  { %967 = vmatprep.subr.bf16.mxu0 %v1043_v26 }
  0x14   :  { %847 = vmatmul.mubr.msk.f32.vlgmr.msra.gmra.mrb[0].mxu0 %vm58_vm0, %v36_v16 }
  0x15   :  { %849 = vmatprep.mubr.msk.f32.mxu0 %vm58_vm0, %v37_v17 }
  0x18   :  { %850 = vmatmul.mubr.msk.f32.gmra.mrb[2].mxu0 %vm58_vm0, %v38_v18 }
  0x19   :  { %852 = vmatprep.mubr.msk.f32.mxu0 %vm58_vm0, %v39_v19 }
  0x1c   :  { %853 = vmatmul.mubr.msk.f32.gmra.mrb[4].mxu0 %vm58_vm0, %v40_v20 }
  0x1d   :  { %855 = vmatprep.mubr.msk.f32.mxu0 %vm58_vm0, %v41_v21 }
  0x20   :  { %856 = vmatmul.mubr.msk.f32.gmra.mrb[6].mxu0 %vm58_vm0, %v42_v22 }
  0xe7   :  { %v848_v28 = vpop.f32.mrb[0].mxu0 }
  0xe8   :  { %v155_v29 = vadd.f32 %v848_v28, %v741_v27  ;;  %v149_v30 = vpop.f32.mrb[1].mxu0 }
  0xe9   :  { %v150_v31 = vadd.f32 %v741_v27, %v149_v30 }
  0xea   :  { %v189_v32 = vmax.f32 %v155_v29, 0.0 }
  0xeb   :  { %v188_v33 = vmax.f32 %v150_v31, 0.0  ;;  %v851_v34 = vpop.f32.mrb[2].mxu0 }
  0xec   :  { %198 = vst.msk [vmem:[%s1319_s9 + $0x8] sm:$0xff] %vm196_vm1, %v189_v32  ;;  %v165_v35 = vadd.f32 %v851_v34, %v741_v27  ;;  %v159_v36 = vpop.f32.mrb[3].mxu0 }
  0xed   :  { %197 = vst.msk [vmem:[%s1319_s9] sm:$0xff] %vm196_vm1, %v188_v33  ;;  %v968_v37 = vpack.c.bf16 %v189_v32, %v188_v33  ;;  %v160_v38 = vadd.f32 %v741_v27, %v159_v36  ;;  %866 = vmatprep.mubr.msk.f32.mxu1 %vm196_vm1, %v188_v33 }
  0xee   :  { %v191_v39 = vmax.f32 %v165_v35, 0.0  ;;  %867 = vmatmul.mubr.msk.f32.vlgmr.msra.gmra.mrb[0].mxu1 %vm196_vm1, %v189_v32 }
  0xef   :  { %v190_v40 = vmax.f32 %v160_v38, 0.0  ;;  %v854_v41 = vpop.f32.mrb[4].mxu0  ;;  %969 = vmatpush3.bf16.msra.mxu0 %v968_v37 }
  0xf0   :  { %200 = vst.msk [vmem:[%s1319_s9 + $0x18] sm:$0xff] %vm196_vm1, %v191_v39  ;;  %v175_v42 = vadd.f32 %v854_v41, %v741_v27  ;;  %v169_v43 = vpop.f32.mrb[5].mxu0  ;;  %970 = vmatprep.subr.bf16.mxu0 %v1043_v26 }
  0xf1   :  { %199 = vst.msk [vmem:[%s1319_s9 + $0x10] sm:$0xff] %vm196_vm1, %v190_v40  ;;  %v971_v44 = vpack.c.bf16 %v191_v39, %v190_v40  ;;  %v170_v45 = vadd.f32 %v741_v27, %v169_v43  ;;  %869 = vmatprep.mubr.msk.f32.mxu1 %vm196_vm1, %v190_v40  ;;  %v1047_v43 = vmov 0  }
  0xf2   :  { %v193_v46 = vmax.f32 %v175_v42, 0.0  ;;  %870 = vmatmul.mubr.msk.f32.gmra.mrb[2].mxu1 %vm196_vm1, %v191_v39  ;;  %v1046_v42 = vmov 0.0   ;;  %990 = vset.pattern.permute.xlu0 %v1047_v43 }
  0xf3   :  { %v192_v47 = vmax.f32 %v170_v45, 0.0  ;;  %v857_v48 = vpop.f32.mrb[6].mxu0  ;;  %972 = vmatpush3.bf16.msra.mxu0 %v971_v44  ;;  %913 = vmatprep.mubr.msk.f32.mxu0 %vm1045_vm2, %v1046_v42  ;;  %v442_v44 = vld [vmem:[%s1321_s6] sm:$0x3] }
  0xf4   :  { %202 = vst.msk [vmem:[%s1319_s9 + $0x28] sm:$0xff] %vm196_vm1, %v193_v46  ;;  %v185_v49 = vadd.f32 %v857_v48, %v741_v27  ;;  %v179_v50 = vpop.f32.mrb[7].mxu0  ;;  %973 = vmatprep.subr.bf16.mxu0 %v1043_v26 }
  0xf5   :  { %201 = vst.msk [vmem:[%s1319_s9 + $0x20] sm:$0xff] %vm196_vm1, %v192_v47  ;;  %v974_v51 = vpack.c.bf16 %v193_v46, %v192_v47  ;;  %v180_v52 = vadd.f32 %v741_v27, %v179_v50  ;;  %872 = vmatprep.mubr.msk.f32.mxu1 %vm196_vm1, %v192_v47 }
  0xf6   :  { %v195_v53 = vmax.f32 %v185_v49, 0.0  ;;  %873 = vmatmul.mubr.msk.f32.gmra.mrb[4].mxu1 %vm196_vm1, %v193_v46 }
  0xf7   :  { %v194_v54 = vmax.f32 %v180_v52, 0.0  ;;  %975 = vmatpush3.bf16.msra.mxu0 %v974_v51 }
  0xf8   :  { %204 = vst.msk [vmem:[%s1319_s9 + $0x38] sm:$0xff] %vm196_vm1, %v195_v53  ;;  %976 = vmatprep.subr.bf16.mxu0 %v1043_v26 }
  0xf9   :  { %203 = vst.msk [vmem:[%s1319_s9 + $0x30] sm:$0xff] %vm196_vm1, %v194_v54  ;;  %v977_v55 = vpack.c.bf16 %v195_v53, %v194_v54  ;;  %875 = vmatprep.mubr.msk.f32.mxu1 %vm196_vm1, %v194_v54 }
  0xfa   :  { %876 = vmatmul.mubr.msk.f32.gmra.mrb[6].mxu1 %vm196_vm1, %v195_v53 }
  0xfb   :  { %978 = vmatpush3.bf16.msra.mxu0 %v977_v55  ;;  %894 = vmatprep.mubr.msk.f32.mxu1 %vm1045_vm2, %v1046_v42 }
  0xfc   :  { %979 = vmatprep.subr.bf16.mxu0 %v1043_v26 }
 0x1c1   :  { %v868_v57 = vpop.f32.mrb[0].mxu1 }
 0x1c2   :  { %v1228_v58 = vadd.f32 %v868_v57, %v750_v56  ;;  %v306_v59 = vpop.f32.mrb[1].mxu1 }
 0x1c3   :  { %v1230_v60 = vadd.f32 %v750_v56, %v306_v59 }
 0x1c4   :  { %v760_v61 = vmul.f32 -1.442695, %v1228_v58 }
 0x1c5   :  { %v759_v62 = vmul.f32 -1.442695, %v1230_v60  ;;  %v871_v63 = vpop.f32.mrb[2].mxu1 }
 0x1c6   :  { %991 = vpow2.f32 %v760_v61  ;;  %v1234_v0 = vadd.f32 %v871_v63, %v750_v56  ;;  %v316_v1 = vpop.f32.mrb[3].mxu1 }
 0x1c7   :  { %993 = vpow2.f32 %v759_v62  ;;  %v1236_v2 = vadd.f32 %v750_v56, %v316_v1 }
 0x1c8   :  { %v762_v3 = vmul.f32 -1.442695, %v1234_v0 }
 0x1c9   :  { %v761_v4 = vmul.f32 -1.442695, %v1236_v2  ;;  %v874_v5 = vpop.f32.mrb[4].mxu1 }
 0x1ca   :  { %995 = vpow2.f32 %v762_v3  ;;  %v1240_v6 = vadd.f32 %v874_v5, %v750_v56  ;;  %v326_v7 = vpop.f32.mrb[5].mxu1 }
 0x1cb   :  { %997 = vpow2.f32 %v761_v4  ;;  %v1242_v8 = vadd.f32 %v750_v56, %v326_v7 }
 0x1cc   :  { %v764_v9 = vmul.f32 -1.442695, %v1240_v6 }
 0x1cd   :  { %v763_v10 = vmul.f32 -1.442695, %v1242_v8  ;;  %v877_v11 = vpop.f32.mrb[6].mxu1 }
 0x1ce   :  { %999 = vpow2.f32 %v764_v9  ;;  %v1246_v12 = vadd.f32 %v877_v11, %v750_v56  ;;  %v336_v13 = vpop.f32.mrb[7].mxu1 }
 0x1cf   :  { %1001 = vpow2.f32 %v763_v10  ;;  %v1248_v14 = vadd.f32 %v750_v56, %v336_v13  ;;  %v441_v10 = vld [vmem:[%s1322_s5] sm:$0x3] }
 0x1d0   :  { %v992_v15 = vpop.eup %991  ;;  %v766_v16 = vmul.f32 -1.442695, %v1246_v12 }
 0x1d1   :  { %v994_v17 = vpop.eup %993  ;;  %v765_v18 = vmul.f32 -1.442695, %v1248_v14  ;;  %v378_v20 = vadd.f32 1.0, %v992_v15 }
 0x1d2   :  { %v377_v19 = vadd.f32 1.0, %v994_v17  ;;  %1003 = vpow2.f32 %v766_v16 }
 0x1d4   :  { %v996_v21 = vpop.eup %995  ;;  %1005 = vrcp.f32 %v377_v19 }
 0x1d5   :  { %v998_v22 = vpop.eup %997  ;;  %1007 = vpow2.f32 %v765_v18  ;;  %v380_v24 = vadd.f32 1.0, %v996_v21 }
 0x1d6   :  { %v379_v23 = vadd.f32 1.0, %v998_v22  ;;  %1009 = vrcp.f32 %v378_v20  ;;  %v632_v22 = vld [vmem:[%s1324_s7] sm:$0xff] }
 0x1d8   :  { %v1000_v25 = vpop.eup %999  ;;  %1011 = vrcp.f32 %v379_v23  ;;  %v633_v23 = vld [vmem:[%s1324_s7 + $0x8] sm:$0xff] }
 0x1d9   :  { %v1002_v27 = vpop.eup %1001  ;;  %v382_v28 = vadd.f32 1.0, %v1000_v25  ;;  %1013 = vrcp.f32 %v380_v24  ;;  %v980_v25 = vpack.c.bf16 %v633_v23, %v632_v22 }
 0x1da   :  { %v381_v29 = vadd.f32 1.0, %v1002_v27 }
 0x1dc   :  { %v1004_v30 = vpop.eup %1003  ;;  %1015 = vrcp.f32 %v381_v29  ;;  %v635_v29 = vld [vmem:[%s1324_s7 + $0x18] sm:$0xff] }
 0x1dd   :  { %v384_v31 = vadd.f32 1.0, %v1004_v30  ;;  %1017 = vrcp.f32 %v382_v28  ;;  %v634_v28 = vld [vmem:[%s1324_s7 + $0x10] sm:$0xff] }
 0x1de   :  { %v1006_v32 = vpop.eup %1005  ;;  %v983_v30 = vpack.c.bf16 %v635_v29, %v634_v28 }
 0x1df   :  { %v1008_v33 = vpop.eup %1007  ;;  %409 = vrot.lane.b32.xlu0 %v1006_v32, %s1044_s4  ;;  %1019 = vrcp.f32 %v384_v31 }
 0x1e0   :  { %v383_v34 = vadd.f32 1.0, %v1008_v33  ;;  %v1010_v35 = vpop.eup %1009  ;;  %v709_v33 = vlaneseq }
 0x1e2   :  { %v1012_v36 = vpop.eup %1011  ;;  %1021 = vrcp.f32 %v383_v34  ;;  %v710_v34 = vshrl.u32 %v709_v33, 7 }
 0x1e3   :  { %413 = vrot.lane.b32.xlu1 %v1012_v36, %s1044_s4  ;;  %411 = vrot.lane.b32.xlu0 %v1010_v35, %s1044_s4  ;;  %v1014_v37 = vpop.eup %1013  ;;  %1023 = vtanh.f32 %v1228_v58  ;;  %v712_v35 = vand.u32 127, %v709_v33 }
 0x1e4   :  { %1025 = vtanh.f32 %v1230_v60 }
 0x1e5   :  { %1027 = vtanh.f32 %v1234_v0  ;;  %vm713_vm6 = vcmp.eq.s32.totalorder %v710_v34, %v712_v35 }
 0x1e6   :  { %v1016_v38 = vpop.eup %1015  ;;  %1029 = vtanh.f32 %v1236_v2  ;;  %v778_v36 = vsel %vm713_vm6, 1.0, %v1046_v42 }
 0x1e7   :  { %415 = vrot.lane.b32.xlu1 %v1014_v37, %s1044_s4  ;;  %417 = vrot.lane.b32.xlu0 %v1016_v38, %s1044_s4  ;;  %v1018_v39 = vpop.eup %1017  ;;  %1031 = vtanh.f32 %v1240_v6 }
 0x1e8   :  { %1033 = vtanh.f32 %v1242_v8 }
 0x1e9   :  { %v1020_v40 = vpop.eup %1019  ;;  %1035 = vtanh.f32 %v1246_v12 }
 0x1ea   :  { %1037 = vtanh.f32 %v1248_v14 }
 0x1eb   :  { %419 = vrot.lane.b32.xlu1 %v1018_v39, %s1044_s4 }
 0x1ec   :  { %v1022_v41 = vpop.eup %1021 }
 0x1ed   :  { %421 = vrot.lane.b32.xlu0 %v1022_v41, %s1044_s4  ;;  %v1024_v46 = vpop.eup %1023 }
 0x1ee   :  { %v1026_v47 = vpop.eup %1025 }
 0x1ef   :  { %423 = vrot.lane.b32.xlu1 %v1020_v40, %s1044_s4  ;;  %v1028_v53 = vpop.eup %1027 }
 0x1f0   :  { %v1030_v55 = vpop.eup %1029 }
 0x1f1   :  { %445 = vperm.xlu0 %990, %v442_v44   ;;  %v1032_v60 = vpop.eup %1031 }
 0x1f2   :  { %v1034_v62 = vpop.eup %1033 }
 0x1f3   :  { %v1036_v3 = vpop.eup %1035 }
 0x1f4   :  { %v1038_v5 = vpop.eup %1037 }
 0x251   :  { %v410_v45 = vpop.permute.xlu0 %409 }
 0x252   :  { %v433_v50 = vmul.f32 %v1026_v47, %v410_v45 }
 0x255   :  { %v414_v48 = vpop.permute.xlu1 %413  ;;  %v412_v49 = vpop.permute.xlu0 %411 }
 0x256   :  { %v434_v51 = vmul.f32 %v1024_v46, %v412_v49  ;;  %v435_v58 = vmul.f32 %v1030_v55, %v414_v48  ;;  %v725_v46 = vld [vmem:[%s1325_s8] sm:$0x1] }
 0x258   :  { %v952_v54 = vpack.c.bf16 %v434_v51, %v433_v50 }
 0x259   :  { %v416_v56 = vpop.permute.xlu1 %415  ;;  %v418_v57 = vpop.permute.xlu0 %417 }
 0x25a   :  { %v436_v59 = vmul.f32 %v1028_v53, %v416_v56  ;;  %954 = vmatpush3.bf16.xpose.msk.msra.mxu1 %vm1269_vm4, %v952_v54  ;;  %v437_v0 = vmul.f32 %v1034_v62, %v418_v57 }
 0x25b   :  { %955 = vmatprep.subr.bf16.mxu1 %v1043_v26 }
 0x25c   :  { %v956_v61 = vpack.c.bf16 %v436_v59, %v435_v58 }
 0x25d   :  { %v420_v63 = vpop.permute.xlu1 %419 }
 0x25e   :  { %v438_v1 = vmul.f32 %v1032_v60, %v420_v63 }
 0x25f   :  { %v422_v2 = vpop.permute.xlu0 %421 }
 0x260   :  { %v960_v4 = vpack.c.bf16 %v438_v1, %v437_v0  ;;  %v439_v7 = vmul.f32 %v1038_v5, %v422_v2 }
 0x261   :  { %v424_v6 = vpop.permute.xlu1 %423 }
 0x262   :  { %v440_v8 = vmul.f32 %v1036_v3, %v424_v6  ;;  %958 = vmatpush3.bf16.xpose.msk.msra.mxu1 %vm1269_vm4, %v956_v61 }
 0x263   :  { %959 = vmatprep.subr.bf16.mxu1 %v1043_v26 }
 0x264   :  { %v964_v9 = vpack.c.bf16 %v440_v8, %v439_v7 }
 0x26a   :  { %962 = vmatpush3.bf16.xpose.msk.msra.mxu1 %vm1269_vm4, %v960_v4 }
 0x26b   :  { %963 = vmatprep.subr.bf16.mxu1 %v1043_v26 }
 0x270   :  { %v446_v11 = vpop.permute.xlu0 %445 }
 0x272   :  { %966 = vmatpush3.bf16.xpose.msk.msra.mxu1 %vm1269_vm4, %v964_v9 }
 0x279   :  { %895 = vmatmul.mubr.msk.f32.vlgmr.msra.gmra.mrb[8].mxu1 %vm448_vm3, %v441_v10 }
 0x34c   :  { %v542_v12 = vpop.f32.mrb[8].mxu1 }
 0x34d   :  { %v543_v13 = vadd.f32 %v542_v12, %v446_v11  ;;  %v896_v14 = vpop.f32.mrb[9].mxu1 }
 0x34f   :  { %v548_v15 = vsel %vm546_vm5, %v543_v13, -inf  ;;  %547 = vst.msk [vmem:[%s1323_s10] sm:$0x3] %vm546_vm5, %v543_v13 }
 0x350   :  { %549 = vmax.xlane.f32.xlu1 %v548_v15 }
 0x3dd   :  { %v550_v16 = vpop.xlane.xlu1 %549 }
 0x3de   :  { %v551_v17 = vsub.f32 %v543_v13, %v550_v16 }
 0x3e0   :  { %v552_v18 = vmul.f32 1.442695, %v551_v17 }
 0x3e2   :  { %1039 = vpow2.f32 %v552_v18 }
 0x3ec   :  { %v1040_v19 = vpop.eup %1039 }
 0x3ed   :  { %v554_v20 = vsel %vm546_vm5, %v1040_v19, 0.0 }
 0x3ee   :  { %555 = vadd.xlane.f32.xlu0 %v554_v20 }
 0x47b   :  { %v556_v21 = vpop.xlane.xlu0 %555 }
 0x47c   :  { %1041 = vrcp.f32 %v556_v21 }
 0x486   :  { %v1042_v24 = vpop.eup %1041 }
 0x487   :  { %v558_v27 = vmul.f32 %v1042_v24, %v1040_v19 }
 0x489   :  { %914 = vmatmul.mubr.msk.f32.vlgmr.msra.gmra.mrb[8].mxu0 %vm58_vm0, %v558_v27 }
 0x48a   :  { %981 = vmatpush3.bf16.msra.mxu0 %v980_v25  ;;  %924 = vmatprep.mubr.msk.f32.mxu0 %vm1045_vm2, %v1046_v42 }
 0x48b   :  { %982 = vmatprep.subr.bf16.mxu0 %v1043_v26 }
 0x48e   :  { %984 = vmatpush3.bf16.msra.mxu0 %v983_v30 }
 0x55c   :  { %v628_v31 = vpop.f32.mrb[8].mxu0 }
 0x55d   :  { %v915_v32 = vpop.f32.mrb[9].mxu0  ;;  %925 = vmatmul.mubr.msk.f32.vlgmr.msra.gmra.mrb[10].mxu0 %vm196_vm1, %v628_v31 }
 0x630   :  { %v705_v37 = vpop.f32.mrb[10].mxu0 }
 0x631   :  { %v716_v38 = vmul.f32 %v778_v36, %v705_v37  ;;  %v926_v39 = vpop.f32.mrb[11].mxu0 }
 0x633   :  { %v718_v40 = vsel %vm717_vm7, %v716_v38, 0.0 }
 0x634   :  { %v719_v41 = vrot.slane %v718_v40, 4 }
 0x636   :  { %v720_v43 = vadd.f32 %v719_v41, %v718_v40 }
 0x638   :  { %v721_v44 = vrot.slane %v720_v43, 2 }
 0x63a   :  { %v722_v26 = vadd.f32 %v721_v44, %v720_v43 }
 0x63c   :  { %v723_v45 = vrot.slane %v722_v26, 1 }
 0x63e   :  { %v724_v47 = vadd.f32 %v723_v45, %v722_v26 }
 0x640   :  { %v726_v48 = vadd.f32 %v725_v46, %v724_v47 }
 0x642   :  { %728 = vst.msk [vmem:[%s1326_s11] sm:$0x1] %vm727_vm8, %v726_v48 }

// kernel: clam_forward.3
= control target key start
LH: loop header
LB: loop body
LE: loop exit
PB: predicated region body
PF: predicated region fallthrough
CT: control target
= control target key end

     0   :  { %v303_v0 = vmov 0   ;;  %v17_v21 = vlaneseq  ;;  %vm41_vm0 = vcmask 523264   ;;  %v304_v24 = vmov 0.0   ;;  %s381_s0 = inlined_call_operand.vmem [shape: s32[16,1], index: 0, kind: input, shape index: {}]   ;;  %s382_s1 = inlined_call_operand.vmem [shape: f32[64,32], index: 1, kind: input, shape index: {}]   ;;  %s383_s2 = inlined_call_operand.vmem [shape: f32[32,2], index: 2, kind: input, shape index: {}]   ;;  %s384_s3 = inlined_call_operand.vmem [shape: f32[1,2], index: 3, kind: input, shape index: {}]   ;;  %s385_s4 = inlined_call_operand.vmem [shape: f32[16,2], index: 4, kind: output, shape index: {}]  }
   0x1   :  { %302 = vset.pattern.permute.xlu0 %v303_v0  ;;  %v19_v1 = vld [vmem:[%s381_s0] sm:$0xff]  ;;  %v34_v3 = vld [vmem:[%s382_s1 + $0x8] sm:$0xff]  ;;  %v35_v4 = vld [vmem:[%s382_s1 + $0x10] sm:$0xff]  ;;  %vm134_vm3 = vcmask 261120   ;;  %vm216_vm4 = vcmask 15360  }
   0x2   :  { %v33_v2 = vld [vmem:[%s382_s1] sm:$0xff]  ;;  %22 = vperm.xlu0 %302, %v19_v1   ;;  %v36_v5 = vld [vmem:[%s382_s1 + $0x18] sm:$0xff]  ;;  %v20_v6 = vld [vmem:[%s381_s0 + $0x8] sm:$0xff]  ;;  %v18_v22 = vand.u32 127, %v17_v21 }
   0x3   :  { %v276_v7 = vpack.c.bf16 %v34_v3, %v33_v2  ;;  %v280_v8 = vpack.c.bf16 %v36_v5, %v35_v4  ;;  %v37_v9 = vld [vmem:[%s382_s1 + $0x20] sm:$0xff]  ;;  %v38_v10 = vld [vmem:[%s382_s1 + $0x28] sm:$0xff]  ;;  %v39_v12 = vld [vmem:[%s382_s1 + $0x30] sm:$0xff] }
   0x4   :  { %v284_v11 = vpack.c.bf16 %v38_v10, %v37_v9  ;;  %v40_v13 = vld [vmem:[%s382_s1 + $0x38] sm:$0xff]  ;;  %v123_v14 = vld [vmem:[%s383_s2] sm:$0xff]  ;;  %v124_v15 = vld [vmem:[%s383_s2 + $0x8] sm:$0xff] }
   0x5   :  { %277 = vmatprep.subr.bf16.mxu0 %v276_v7  ;;  %v125_v16 = vld [vmem:[%s383_s2 + $0x10] sm:$0xff]  ;;  %v292_v17 = vpack.c.bf16 %v124_v15, %v123_v14  ;;  %v126_v18 = vld [vmem:[%s383_s2 + $0x18] sm:$0xff]  ;;  %v288_v19 = vpack.c.bf16 %v40_v13, %v39_v12  ;;  %v227_v30 = vld [vmem:[%s384_s3] ss:$0 sm:$0xff] }
   0x6   :  { %25 = vperm.xlu0 %302, %v20_v6   ;;  %279 = vmatpush3.bf16.msra.mxu0 %v276_v7  ;;  %v296_v20 = vpack.c.bf16 %v126_v18, %v125_v16 }
   0x7   :  { %281 = vmatprep.subr.bf16.mxu0 %v280_v8  ;;  %293 = vmatprep.subr.bf16.mxu1 %v292_v17 }
   0x8   :  { %295 = vmatpush3.bf16.msra.mxu1 %v292_v17 }
   0x9   :  { %297 = vmatprep.subr.bf16.mxu1 %v296_v20 }
   0xa   :  { %283 = vmatpush3.bf16.msra.mxu0 %v280_v8 }
   0xb   :  { %285 = vmatprep.subr.bf16.mxu0 %v284_v11 }
   0xc   :  { %299 = vmatpush3.bf16.msra.mxu1 %v296_v20 }
   0xe   :  { %287 = vmatpush3.bf16.msra.mxu0 %v284_v11 }
   0xf   :  { %289 = vmatprep.subr.bf16.mxu0 %v288_v19 }
  0x12   :  { %291 = vmatpush3.bf16.msra.mxu0 %v288_v19 }
  0x81   :  { %v23_v23 = vpop.permute.xlu0 %22 }
  0x82   :  { %vm27_vm1 = vcmp.eq.s32.totalorder %v18_v22, %v23_v23 }
  0x83   :  { %v223_v25 = vsel %vm27_vm1, 1.0, %v304_v24 }
  0x84   :  { %262 = vmatprep.mubr.msk.f32.mxu0 %vm41_vm0, %v223_v25 }
  0x85   :  { %v26_v26 = vpop.permute.xlu0 %25 }
  0x86   :  { %vm28_vm2 = vcmp.eq.s32.totalorder %v18_v22, %v26_v26 }
  0x87   :  { %v224_v27 = vsel %vm28_vm2, 1.0, %v304_v24 }
  0x88   :  { %263 = vmatmul.mubr.msk.f32.vlgmr.msra.gmra.mrb[0].mxu0 %vm41_vm0, %v224_v27 }
 0x15b   :  { %v264_v28 = vpop.f32.mrb[0].mxu0 }
 0x15c   :  { %v114_v29 = vpop.f32.mrb[1].mxu0 }
 0x15d   :  { %273 = vmatprep.mubr.msk.f32.mxu1 %vm134_vm3, %v114_v29 }
 0x15e   :  { %274 = vmatmul.mubr.msk.f32.vlgmr.msra.gmra.mrb[0].mxu1 %vm134_vm3, %v264_v28 }
 0x231   :  { %v275_v31 = vpop.f32.mrb[0].mxu1 }
 0x232   :  { %v213_v32 = vadd.f32 %v275_v31, %v227_v30  ;;  %v207_v33 = vpop.f32.mrb[1].mxu1 }
 0x233   :  { %v208_v34 = vadd.f32 %v227_v30, %v207_v33 }
 0x234   :  { %218 = vst.msk [vmem:[%s385_s4 + $0x8] sm:$0xff] %vm216_vm4, %v213_v32 }
 0x235   :  { %217 = vst.msk [vmem:[%s385_s4] sm:$0xff] %vm216_vm4, %v208_v34 }

</bundles_post_ra>
